<compile_context>
chip_gen: v7x
topology: tpu7x:2x2x1
jax: 0.10.0
libtpu: 0.0.40
codegen_flags: <defaults>
</compile_context>

<pallas_src>
import functools
import math

import jax
import jax.numpy as jnp
from jax.experimental import pallas as pl
from jax.experimental.pallas import tpu as pltpu

NEG_BIG = -1e32   # matches PyTorch's (1 - mask) * -1e+32 bias
PAD_NEG = -1e30   # bias on padded tag columns -> exp() underflows to 0


def _round_up(x, m):
    return ((x + m - 1) // m) * m


def _pick_tile_m(tile_m, N, H, C_pad, itemsize, budget=24 * 1024 * 1024):
    """Largest row tile (multiple of 8) whose double-buffered blocks fit VMEM."""
    tm = max(8, min(_round_up(tile_m, 8), _round_up(N, 8)))

    def vmem_bytes(t):
        return (2 * t * H * itemsize          # hiddens row tile (double-buffered)
                + 2 * t * C_pad * itemsize    # prob output tile (double-buffered)
                + 2 * H * C_pad * itemsize    # resident weight (double-buffered)
                + 4 * t * C_pad * 4)          # f32 logits/exp temporaries (slack)

    while tm > 8 and vmem_bytes(tm) > budget:
        tm = max(8, _round_up(tm // 2, 8))
    return tm


# ----------------------------------------------------------------------------
# Kernels
# ----------------------------------------------------------------------------
def _softmax_block(h, w, b, mask):
    """Shared hot path: logits = h @ w + b + (1-mask)*NEG_BIG, f32 softmax."""
    logits = jnp.dot(h, w, preferred_element_type=jnp.float32)   # [M, C_pad] MXU
    logits = logits + b                                          # [1, C_pad] (padded cols = PAD_NEG)
    logits = logits + (1.0 - mask) * NEG_BIG                     # [M, 1] row bias
    m = jnp.max(logits, axis=-1, keepdims=True)
    e = jnp.exp(logits - m)
    s = jnp.sum(e, axis=-1, keepdims=True)
    prob = e * pl.reciprocal(s, approx=True)                     # EUP reciprocal
    logsumexp = jnp.log(s) + m
    return logits, prob, logsumexp


def _infer_kernel(h_ref, w_ref, b_ref, mask_ref, prob_ref):
    _, prob, _ = _softmax_block(h_ref[...], w_ref[...], b_ref[...], mask_ref[...])
    prob_ref[...] = prob.astype(prob_ref.dtype)


def _train_kernel(h_ref, w_ref, b_ref, mask_ref, labels_ref,
                  prob_ref, loss_ref, *, pad_id):
    logits, prob, logsumexp = _softmax_block(
        h_ref[...], w_ref[...], b_ref[...], mask_ref[...])
    prob_ref[...] = prob.astype(prob_ref.dtype)

    # per-token cross entropy with ignore_index = pad_id (labels always < C)
    labels = labels_ref[...]                                      # [M, 1] int32
    col = jax.lax.broadcasted_iota(jnp.int32, logits.shape, 1)
    label_logit = jnp.sum(jnp.where(col == labels, logits, 0.0),
                          axis=-1, keepdims=True)                 # [M, 1]
    valid = (labels != pad_id).astype(jnp.float32)                # [M, 1]
    nll = jnp.where(valid > 0.0, logsumexp - label_logit, 0.0)

    # Emit ONE tiny per-tile partial block instead of an [N, 2] HBM stream.
    nll_sum = jnp.sum(nll)
    valid_sum = jnp.sum(valid)
    sub = jax.lax.broadcasted_iota(jnp.int32, loss_ref.shape, 0)
    lane = jax.lax.broadcasted_iota(jnp.int32, loss_ref.shape, 1)
    first = sub == 0
    loss_ref[...] = jnp.where(first & (lane == 0), nll_sum,
                              jnp.where(first & (lane == 1), valid_sum, 0.0))


# ----------------------------------------------------------------------------
# Wrapper
# ----------------------------------------------------------------------------
def tagging_fnn_decoder(hiddens, mask, weight, bias, labels=None, pad_id=0,
                        *, tile_m=512):
    """JAX/Pallas equivalent of TaggingFNNDecoder.forward."""
    B, T, H = hiddens.shape
    C = weight.shape[0]                          # weight: [num_tags, input_size]
    N = B * T

    in_dtype = hiddens.dtype                     # keep native dtype (no f32 upcast)
    itemsize = jnp.dtype(in_dtype).itemsize

    # lane-dense tag dim; padded columns get PAD_NEG bias so they contribute 0
    C_pad = _round_up(max(C, 1), 128)
    # full row tiles only (pad N); padded rows: mask=0, label=pad_id -> inert
    TILE_M = _pick_tile_m(tile_m, N, H, C_pad, itemsize)
    N_pad = _round_up(N, TILE_M)
    n_tiles = N_pad // TILE_M

    h2 = hiddens.reshape(N, H)
    m2 = mask.reshape(N, 1).astype(jnp.float32)
    if N_pad != N:
        h2 = jnp.pad(h2, ((0, N_pad - N), (0, 0)))
        m2 = jnp.pad(m2, ((0, N_pad - N), (0, 0)))

    w = jnp.pad(weight.T.astype(in_dtype), ((0, 0), (0, C_pad - C)))   # [H, C_pad]
    b = jnp.full((1, C_pad), PAD_NEG, jnp.float32)
    b = b.at[:, :C].set(bias.astype(jnp.float32)[None, :])

    in_specs = [
        pl.BlockSpec((TILE_M, H), lambda i: (i, 0)),       # hiddens row tile
        pl.BlockSpec((H, C_pad), lambda i: (0, 0)),        # weight^T (resident)
        pl.BlockSpec((1, C_pad), lambda i: (0, 0)),        # bias (resident)
        pl.BlockSpec((TILE_M, 1), lambda i: (i, 0)),       # mask row tile
    ]
    prob_spec = pl.BlockSpec((TILE_M, C_pad), lambda i: (i, 0))
    compiler_params = pltpu.CompilerParams(
        dimension_semantics=("parallel",),
        vmem_limit_bytes=64 * 1024 * 1024,
    )
    cost = pl.CostEstimate(
        flops=2 * N_pad * H * C_pad,
        transcendentals=N_pad * C_pad,
        bytes_accessed=(N_pad * H + H * C_pad + N_pad * C_pad) * itemsize
                       + 8 * N_pad,
    )

    if labels is None:
        prob = pl.pallas_call(
            _infer_kernel,
            out_shape=jax.ShapeDtypeStruct((N_pad, C_pad), in_dtype),
            grid=(n_tiles,),
            in_specs=in_specs,
            out_specs=prob_spec,
            compiler_params=compiler_params,
            cost_estimate=cost,
        )(h2, w, b, m2)
        return (prob[:N, :C].reshape(B, T, C),)

    labels2 = labels.reshape(N, 1).astype(jnp.int32)
    if N_pad != N:
        labels2 = jnp.pad(labels2, ((0, N_pad - N), (0, 0)),
                          constant_values=pad_id)

    kernel = functools.partial(_train_kernel, pad_id=pad_id)
    prob, partials = pl.pallas_call(
        kernel,
        out_shape=(jax.ShapeDtypeStruct((N_pad, C_pad), in_dtype),
                   jax.ShapeDtypeStruct((n_tiles * 8, 128), jnp.float32)),
        grid=(n_tiles,),
        in_specs=in_specs + [pl.BlockSpec((TILE_M, 1), lambda i: (i, 0))],
        out_specs=(prob_spec, pl.BlockSpec((8, 128), lambda i: (i, 0))),
        compiler_params=compiler_params,
        cost_estimate=cost,
    )(h2, w, b, m2, labels2)

    prob = prob[:N, :C].reshape(B, T, C)
    # CrossEntropyLoss(ignore_index=pad_id): mean over non-ignored tokens.
    loss = jnp.sum(partials[:, 0]) / jnp.sum(partials[:, 1])
    return (prob, loss)


# ----------------------------------------------------------------------------
# Pure-JAX reference + init
# ----------------------------------------------------------------------------
def _reference(hiddens, mask, weight, bias, labels, pad_id):
    logits = jnp.einsum("bth,ch->btc", hiddens.astype(jnp.float32),
                        weight.astype(jnp.float32)) + bias.astype(jnp.float32)
    logits = logits + (1.0 - mask.astype(jnp.float32))[..., None] * NEG_BIG
    prob = jax.nn.softmax(logits, axis=-1)
    lse = jax.nn.logsumexp(logits, axis=-1)
    ll = jnp.take_along_axis(logits, labels[..., None], axis=-1)[..., 0]
    valid = (labels != pad_id).astype(jnp.float32)
    loss = jnp.sum(jnp.where(valid > 0, lse - ll, 0.0)) / jnp.sum(valid)
    return prob, loss


def init_params(key, input_size, num_tags):
    """Deterministic nn.Linear-style init: U(-1/sqrt(fan_in), 1/sqrt(fan_in))."""
    kw, kb = jax.random.split(key)
    bound = 1.0 / math.sqrt(input_size)
    weight = jax.random.uniform(kw, (num_tags, input_size), jnp.float32,
                                minval=-bound, maxval=bound)
    bias = jax.random.uniform(kb, (num_tags,), jnp.float32,
                              minval=-bound, maxval=bound)
    return weight, bias


if __name__ == "__main__":
    B, T, H = 2, 8, 32
    NUM_TAGS = 8
    PAD_ID = 0

    key = jax.random.PRNGKey(0)
    k_h, k_l, k_p = jax.random.split(key, 3)

    weight, bias = init_params(k_p, H, NUM_TAGS)

    hiddens = jax.random.normal(k_h, (B, T, H), jnp.float32)
    lengths = jnp.array([8, 5], dtype=jnp.int32)             # sequence lengths
    pos = jnp.arange(T)[None, :]
    mask = (pos < lengths[:, None]).astype(jnp.float32)      # [B, T]
    labels = jax.random.randint(k_l, (B, T), 1, NUM_TAGS, jnp.int32)
    labels = jnp.where(mask > 0, labels, PAD_ID)              # pad positions ignored

    # training path: prob + loss
    prob, loss = tagging_fnn_decoder(hiddens, mask, weight, bias,
                                     labels=labels, pad_id=PAD_ID)
    jax.block_until_ready((prob, loss))

    ref_prob, ref_loss = _reference(hiddens, mask, weight, bias, labels, PAD_ID)
    assert prob.shape == (B, T, NUM_TAGS)
    assert bool(jnp.all(jnp.isfinite(loss)))
    assert bool(jnp.allclose(prob, ref_prob, atol=5e-3))
    assert bool(jnp.allclose(loss, ref_loss, atol=1e-3, rtol=1e-3))
    assert bool(jnp.allclose(jnp.sum(prob, axis=-1), 1.0, atol=5e-3))

    # inference path: prob only, bf16 activations (halves the dominant HBM stream)
    (prob_bf16,) = tagging_fnn_decoder(hiddens.astype(jnp.bfloat16), mask,
                                       weight, bias, pad_id=PAD_ID)
    jax.block_until_ready(prob_bf16)
    assert prob_bf16.shape == (B, T, NUM_TAGS)
    assert bool(jnp.allclose(jnp.sum(prob_bf16.astype(jnp.float32), axis=-1),
                             1.0, atol=3e-2))

    print("KERNEL_OK")
</pallas_src>

<mosaic_0001>
module attributes {stable_mosaic.version = 11 : i64} {
  func.func @_train_kernel(%arg0: i32, %arg1: memref<16x32xf32, #tpu.memory_space<vmem>>, %arg2: memref<32x128xf32, #tpu.memory_space<vmem>>, %arg3: memref<1x128xf32, #tpu.memory_space<vmem>>, %arg4: memref<16x1xf32, #tpu.memory_space<vmem>>, %arg5: memref<16x1xi32, #tpu.memory_space<vmem>>, %arg6: memref<16x128xf32, #tpu.memory_space<vmem>>, %arg7: memref<8x128xf32, #tpu.memory_space<vmem>>) attributes {dimension_semantics = [#tpu.dimension_semantics<parallel>], iteration_bounds = array<i64: 1>, scalar_prefetch = 0 : i64, scratch_operands = 0 : i64, tpu.core_type = #tpu.core_type<tc>, window_params = [{transform_indices = @transform_0, window_bounds = array<i64: 16, 32>}, {pipeline_mode = #tpu.pipeline_mode<synchronous>, transform_indices = @transform_1, window_bounds = array<i64: 32, 128>}, {pipeline_mode = #tpu.pipeline_mode<synchronous>, transform_indices = @transform_2, window_bounds = array<i64: 1, 128>}, {transform_indices = @transform_3, window_bounds = array<i64: 16, 1>}, {transform_indices = @transform_4, window_bounds = array<i64: 16, 1>}, {transform_indices = @transform_5, window_bounds = array<i64: 16, 128>}, {transform_indices = @transform_6, window_bounds = array<i64: 8, 128>}]} {
    %c0 = arith.constant 0 : index
    %c0_0 = arith.constant 0 : index
    %0 = vector.load %arg1[%c0, %c0_0] : memref<16x32xf32, #tpu.memory_space<vmem>>, vector<16x32xf32>
    %c0_1 = arith.constant 0 : index
    %c0_2 = arith.constant 0 : index
    %1 = vector.load %arg2[%c0_1, %c0_2] : memref<32x128xf32, #tpu.memory_space<vmem>>, vector<32x128xf32>
    %c0_3 = arith.constant 0 : index
    %c0_4 = arith.constant 0 : index
    %2 = vector.load %arg3[%c0_3, %c0_4] : memref<1x128xf32, #tpu.memory_space<vmem>>, vector<1x128xf32>
    %c0_5 = arith.constant 0 : index
    %c0_6 = arith.constant 0 : index
    %3 = vector.load %arg4[%c0_5, %c0_6] : memref<16x1xf32, #tpu.memory_space<vmem>>, vector<16x1xf32>
    %cst = arith.constant dense<0.000000e+00> : vector<16x128xf32>
    %4 = tpu.matmul %0, %1, %cst {dimension_numbers = #tpu.dot_dimension_numbers<[1], [0], [0], [1], [0, 0, 1, 1], [], []>} : vector<16x32xf32>, vector<32x128xf32>, vector<16x128xf32> -> vector<16x128xf32>
    %5 = vector.broadcast %2 : vector<1x128xf32> to vector<16x128xf32>
    %6 = arith.addf %4, %5 : vector<16x128xf32>
    %cst_7 = arith.constant 1.000000e+00 : f32
    %7 = vector.broadcast %cst_7 : f32 to vector<16x1xf32>
    %8 = arith.subf %7, %3 : vector<16x1xf32>
    %cst_8 = arith.constant -1.000000e+32 : f32
    %9 = vector.broadcast %cst_8 : f32 to vector<16x1xf32>
    %10 = arith.mulf %8, %9 : vector<16x1xf32>
    %11 = vector.broadcast %10 : vector<16x1xf32> to vector<16x128xf32>
    %12 = arith.addf %6, %11 : vector<16x128xf32>
    %cst_9 = arith.constant dense<0xFF800000> : vector<16xf32>
    %13 = vector.multi_reduction <maximumf>, %12, %cst_9 [1] : vector<16x128xf32> to vector<16xf32>
    %14 = vector.shape_cast %13 : vector<16xf32> to vector<16x1xf32>
    %15 = vector.broadcast %14 : vector<16x1xf32> to vector<16x128xf32>
    %16 = arith.subf %12, %15 : vector<16x128xf32>
    %17 = math.exp %16 : vector<16x128xf32>
    %cst_10 = arith.constant dense<0.000000e+00> : vector<16xf32>
    %18 = vector.multi_reduction <add>, %17, %cst_10 [1] : vector<16x128xf32> to vector<16xf32>
    %19 = vector.shape_cast %18 : vector<16xf32> to vector<16x1xf32>
    %20 = tpu.reciprocal %19 {approx = true} : vector<16x1xf32> -> vector<16x1xf32>
    %21 = vector.broadcast %20 : vector<16x1xf32> to vector<16x128xf32>
    %22 = arith.mulf %17, %21 : vector<16x128xf32>
    %23 = math.log %19 : vector<16x1xf32>
    %24 = arith.addf %23, %14 : vector<16x1xf32>
    %c0_11 = arith.constant 0 : index
    %c0_12 = arith.constant 0 : index
    %25 = vector.load %arg6[%c0_11, %c0_12] : memref<16x128xf32, #tpu.memory_space<vmem>>, vector<16x128xf32>
    tpu.vector_store %arg6[%c0_11, %c0_12], %22 {strides = array<i32>} : memref<16x128xf32, #tpu.memory_space<vmem>>, vector<16x128xf32>,
    %c0_13 = arith.constant 0 : index
    %c0_14 = arith.constant 0 : index
    %26 = vector.load %arg5[%c0_13, %c0_14] : memref<16x1xi32, #tpu.memory_space<vmem>>, vector<16x1xi32>
    %27 = tpu.iota {dimensions = array<i32: 1>} : vector<16x128xi32>
    %28 = vector.broadcast %26 : vector<16x1xi32> to vector<16x128xi32>
    %29 = arith.cmpi eq, %27, %28 : vector<16x128xi32>
    %cst_15 = arith.constant 0.000000e+00 : f32
    %30 = vector.broadcast %cst_15 : f32 to vector<16x128xf32>
    %31 = arith.select %29, %12, %30 : vector<16x128xi1>, vector<16x128xf32>
    %cst_16 = arith.constant dense<0.000000e+00> : vector<16xf32>
    %32 = vector.multi_reduction <add>, %31, %cst_16 [1] : vector<16x128xf32> to vector<16xf32>
    %33 = vector.shape_cast %32 : vector<16xf32> to vector<16x1xf32>
    %c0_i32 = arith.constant 0 : i32
    %34 = vector.broadcast %c0_i32 : i32 to vector<16x1xi32>
    %35 = arith.cmpi ne, %26, %34 : vector<16x1xi32>
    %36 = arith.extui %35 : vector<16x1xi1> to vector<16x1xi32>
    %37 = arith.sitofp %36 : vector<16x1xi32> to vector<16x1xf32>
    %cst_17 = arith.constant 0.000000e+00 : f32
    %38 = vector.broadcast %cst_17 : f32 to vector<16x1xf32>
    %39 = arith.cmpf ogt, %37, %38 : vector<16x1xf32>
    %40 = arith.subf %24, %33 : vector<16x1xf32>
    %cst_18 = arith.constant 0.000000e+00 : f32
    %41 = vector.broadcast %cst_18 : f32 to vector<16x1xf32>
    %42 = arith.select %39, %40, %41 : vector<16x1xi1>, vector<16x1xf32>
    %43 = vector.shape_cast %42 : vector<16x1xf32> to vector<1x16x1xf32>
    %cst_19 = arith.constant dense<0.000000e+00> : vector<1xf32>
    %44 = vector.multi_reduction <add>, %43, %cst_19 [1, 2] : vector<1x16x1xf32> to vector<1xf32>
    %45 = vector.shape_cast %44 : vector<1xf32> to vector<1x1x1xf32>
    %46 = vector.extract %45[0, 0, 0] : f32 from vector<1x1x1xf32>
    %47 = vector.shape_cast %37 : vector<16x1xf32> to vector<1x16x1xf32>
    %cst_20 = arith.constant dense<0.000000e+00> : vector<1xf32>
    %48 = vector.multi_reduction <add>, %47, %cst_20 [1, 2] : vector<1x16x1xf32> to vector<1xf32>
    %49 = vector.shape_cast %48 : vector<1xf32> to vector<1x1x1xf32>
    %50 = vector.extract %49[0, 0, 0] : f32 from vector<1x1x1xf32>
    %51 = tpu.iota {dimensions = array<i32: 0>} : vector<8x128xi32>
    %52 = tpu.iota {dimensions = array<i32: 1>} : vector<8x128xi32>
    %c0_i32_21 = arith.constant 0 : i32
    %53 = vector.broadcast %c0_i32_21 : i32 to vector<8x128xi32>
    %54 = arith.cmpi eq, %51, %53 : vector<8x128xi32>
    %c0_i32_22 = arith.constant 0 : i32
    %55 = vector.broadcast %c0_i32_22 : i32 to vector<8x128xi32>
    %56 = arith.cmpi eq, %52, %55 : vector<8x128xi32>
    %57 = arith.andi %54, %56 : vector<8x128xi1>
    %c1_i32 = arith.constant 1 : i32
    %58 = vector.broadcast %c1_i32 : i32 to vector<8x128xi32>
    %59 = arith.cmpi eq, %52, %58 : vector<8x128xi32>
    %60 = arith.andi %54, %59 : vector<8x128xi1>
    %cst_23 = arith.constant 0.000000e+00 : f32
    %61 = vector.broadcast %50 : f32 to vector<8x128xf32>
    %62 = vector.broadcast %cst_23 : f32 to vector<8x128xf32>
    %63 = arith.select %60, %61, %62 : vector<8x128xi1>, vector<8x128xf32>
    %64 = vector.broadcast %46 : f32 to vector<8x128xf32>
    %65 = arith.select %57, %64, %63 : vector<8x128xi1>, vector<8x128xf32>
    %c0_24 = arith.constant 0 : index
    %c0_25 = arith.constant 0 : index
    %66 = vector.load %arg7[%c0_24, %c0_25] : memref<8x128xf32, #tpu.memory_space<vmem>>, vector<8x128xf32>
    tpu.vector_store %arg7[%c0_24, %c0_25], %65 {strides = array<i32>} : memref<8x128xf32, #tpu.memory_space<vmem>>, vector<8x128xf32>,
    return
  }
  func.func @transform_0(%arg0: i32) -> (i32, i32) {
    %c0_i32 = arith.constant 0 : i32
    %c0_i32_0 = arith.constant 0 : i32
    return %arg0, %c0_i32 : i32, i32
  }
  func.func @transform_1(%arg0: i32) -> (i32, i32) {
    %c0_i32 = arith.constant 0 : i32
    %c0_i32_0 = arith.constant 0 : i32
    %c0_i32_1 = arith.constant 0 : i32
    return %c0_i32, %c0_i32_0 : i32, i32
  }
  func.func @transform_2(%arg0: i32) -> (i32, i32) {
    %c0_i32 = arith.constant 0 : i32
    %c0_i32_0 = arith.constant 0 : i32
    %c0_i32_1 = arith.constant 0 : i32
    return %c0_i32, %c0_i32_0 : i32, i32
  }
  func.func @transform_3(%arg0: i32) -> (i32, i32) {
    %c0_i32 = arith.constant 0 : i32
    %c0_i32_0 = arith.constant 0 : i32
    return %arg0, %c0_i32 : i32, i32
  }
  func.func @transform_4(%arg0: i32) -> (i32, i32) {
    %c0_i32 = arith.constant 0 : i32
    %c0_i32_0 = arith.constant 0 : i32
    return %arg0, %c0_i32 : i32, i32
  }
  func.func @transform_5(%arg0: i32) -> (i32, i32) {
    %c0_i32 = arith.constant 0 : i32
    %c0_i32_0 = arith.constant 0 : i32
    return %arg0, %c0_i32 : i32, i32
  }
  func.func @transform_6(%arg0: i32) -> (i32, i32) {
    %c0_i32 = arith.constant 0 : i32
    %c0_i32_0 = arith.constant 0 : i32
    return %arg0, %c0_i32 : i32, i32
  }
}

</mosaic_0001>

<bundles_post_ra>
// kernel: tpu_custom_call.1
= control target key start
LH: loop header
LB: loop body
LE: loop exit
PB: predicated region body
PF: predicated region fallthrough
CT: control target
= control target key end

     0   :  { %12 = vsyncpa [#allocation3], 0  ;;  %s714_s0 = inlined_call_operand.hbm [shape: f32[16,32], index: 0, kind: input, shape index: {}]   ;;  %s715_s1 = inlined_call_operand.hbm [shape: f32[32,128], index: 1, kind: input, shape index: {}]   ;;  %s716_s2 = inlined_call_operand.hbm [shape: f32[1,128], index: 2, kind: input, shape index: {}]   ;;  %s717_s3 = inlined_call_operand.hbm [shape: f32[16,1], index: 3, kind: input, shape index: {}]   ;;  %s718_s4 = inlined_call_operand.hbm [shape: s32[16,1], index: 4, kind: input, shape index: {}]   ;;  %s719_s5 = inlined_call_operand.hbm [shape: f32[16,128], index: 5, kind: output, shape index: {0}]   ;;  %s720_s6 = inlined_call_operand.hbm [shape: f32[8,128], index: 6, kind: output, shape index: {1}]  }
   0x1   :  { %13 = vsyncpa [#allocation6], 0 }
   0x2   :  { %14 = vsyncpa [#allocation9], 0 }
   0x3   :  { %15 = vsyncpa [#allocation4], 0 }
   0x4   :  { %16 = vsyncpa [#allocation13], 0  ;;  %s552_s21 = smov [#allocation5]   ;;  %s553_s23 = smov [#allocation8]  }
   0x5   :  { %s34_s22 = sshll.u32 %s552_s21, 4  ;;  %s56_s24 = sshll.u32 %s553_s23, 4  ;;  %s35_s22 = int_to_ptr.vmem [resolvable:$true] %s34_s22  ;;  %s598_s24 = int_to_ptr.vmem [resolvable:$true] %s56_s24 }
   0x6   :  { %s388_s27 = scalar_lea.hbm %s715_s1, 512 }
   0x7   :  { %p389_p0 = scmp.ne.s32.totalorder %s715_s1, %s388_s27  ;;  %p392_p1 = scmp.lt.u32.totalorder %s388_s27, %s715_s1 }
   0x9   :  { %p394_p2 = pnand %p392_p1, %p389_p0 }
   0xb   :  { %397 = shalt.err (!%p394_p2)
}
   0xc   :  { %s398_s8 = scalar_lea.vmem %s35_s22, 512  ;;  %p403_p4 = scmp.lt.s32.totalorder %s35_s22, %s35_s22 }
   0xd   :  { %p399_p3 = scmp.ne.s32.totalorder %s35_s22, %s398_s8  ;;  %p404_p5 = scmp.lt.s32.totalorder %s398_s8, %s398_s8 }
   0xf   :  { %p405_p6 = por %p404_p5, %p403_p4 }
  0x11   :  { %p406_p7 = pnand %p405_p6, %p399_p3 }
  0x13   :  { %409 = shalt.err (!%p406_p7)
}
  0x14   :  { %s554_s9 = smov 128   ;;  %s555_s10 = smov 8  }
  0x15   :  { %40 = dma.hbm_to_vmem [thread:$0]  %s715_s1, 512, %s35_s22, [#allocation6], %s554_s9, %s554_s9, %s555_s10  }
  0x16   :  { %s410_s15 = scalar_lea.hbm %s717_s3, 256 }
  0x17   :  { %p411_p8 = scmp.ne.s32.totalorder %s717_s3, %s410_s15  ;;  %p414_p9 = scmp.lt.u32.totalorder %s410_s15, %s717_s3 }
  0x19   :  { %p416_p10 = pnand %p414_p9, %p411_p8 }
  0x1b   :  { %419 = shalt.err (!%p416_p10)
}
  0x1c   :  { %s420_s20 = scalar_lea.vmem %s598_s24, 256  ;;  %p425_p12 = scmp.lt.s32.totalorder %s598_s24, %s598_s24 }
  0x1d   :  { %p421_p11 = scmp.ne.s32.totalorder %s598_s24, %s420_s20  ;;  %p426_p13 = scmp.lt.s32.totalorder %s420_s20, %s420_s20 }
  0x1f   :  { %p427_p0 = por %p426_p13, %p425_p12 }
  0x21   :  { %p428_p1 = pnand %p427_p0, %p421_p11 }
  0x23   :  { %431 = shalt.err (!%p428_p1)
}
  0x24   :  { %62 = dma.hbm_to_vmem [thread:$0]  %s717_s3, 256, %s598_s24, [#allocation9], %s554_s9, %s554_s9, %s555_s10  }
  0x25   :  { %s556_s22 = smov [#allocation2]   ;;  %s557_s25 = smov [#allocation7]  }
  0x26   :  { %s22_s23 = sshll.u32 %s556_s22, 4  ;;  %s47_s26 = sshll.u32 %s557_s25, 4  ;;  %s23_s23 = int_to_ptr.vmem [resolvable:$true] %s22_s23  ;;  %s48_s26 = int_to_ptr.vmem [resolvable:$true] %s47_s26 }
  0x27   :  { %s432_s29 = scalar_lea.hbm %s714_s0, 256 }
  0x28   :  { %p433_p2 = scmp.ne.s32.totalorder %s714_s0, %s432_s29  ;;  %p436_p3 = scmp.lt.u32.totalorder %s432_s29, %s714_s0 }
  0x2a   :  { %p438_p4 = pnand %p436_p3, %p433_p2 }
  0x2c   :  { %441 = shalt.err (!%p438_p4)
}
  0x2d   :  { %s442_s3 = scalar_lea.vmem %s23_s23, 256  ;;  %p447_p6 = scmp.lt.s32.totalorder %s23_s23, %s23_s23 }
  0x2e   :  { %p443_p5 = scmp.ne.s32.totalorder %s23_s23, %s442_s3  ;;  %p448_p7 = scmp.lt.s32.totalorder %s442_s3, %s442_s3 }
  0x30   :  { %p449_p8 = por %p448_p7, %p447_p6 }
  0x32   :  { %p450_p9 = pnand %p449_p8, %p443_p5 }
  0x34   :  { %453 = shalt.err (!%p450_p9)
}
  0x35   :  { %28 = dma.hbm_to_vmem [thread:$0]  %s714_s0, 256, %s23_s23, [#allocation3], %s554_s9, %s554_s9, %s555_s10  }
  0x36   :  { %s454_s15 = scalar_lea.hbm %s716_s2, 16 }
  0x37   :  { %p455_p10 = scmp.ne.s32.totalorder %s716_s2, %s454_s15  ;;  %p458_p11 = scmp.lt.u32.totalorder %s454_s15, %s716_s2 }
  0x39   :  { %p460_p12 = pnand %p458_p11, %p455_p10 }
  0x3b   :  { %463 = shalt.err (!%p460_p12)
}
  0x3c   :  { %s464_s20 = scalar_lea.vmem %s48_s26, 16  ;;  %s468_s1 = scalar_lea.vmem %s48_s26, 32 }
  0x3d   :  { %p465_p13 = scmp.ne.s32.totalorder %s48_s26, %s464_s20  ;;  %p469_p0 = scmp.lt.s32.totalorder %s48_s26, %s48_s26 }
  0x3e   :  { %p470_p1 = scmp.lt.s32.totalorder %s468_s1, %s464_s20 }
  0x40   :  { %p471_p2 = por %p470_p1, %p469_p0 }
  0x42   :  { %p472_p3 = pnand %p471_p2, %p465_p13 }
  0x44   :  { %475 = shalt.err (!%p472_p3)
}
  0x45   :  { %50 = dma.hbm_to_vmem [thread:$0]  %s716_s2, 16, %s48_s26, [#allocation6]  }
  0x46   :  { %s558_s22 = smov [#allocation10]   ;;  %s476_s28 = scalar_lea.hbm %s718_s4, 256 }
  0x47   :  { %s68_s23 = sshll.u32 %s558_s22, 4  ;;  %p477_p4 = scmp.ne.s32.totalorder %s718_s4, %s476_s28  ;;  %s69_s23 = int_to_ptr.vmem [resolvable:$true] %s68_s23 }
  0x48   :  { %p480_p5 = scmp.lt.u32.totalorder %s476_s28, %s718_s4 }
  0x4a   :  { %p482_p6 = pnand %p480_p5, %p477_p4 }
  0x4c   :  { %485 = shalt.err (!%p482_p6)
}
  0x4d   :  { %s486_s11 = scalar_lea.vmem %s69_s23, 256  ;;  %p491_p8 = scmp.lt.s32.totalorder %s69_s23, %s69_s23 }
  0x4e   :  { %p487_p7 = scmp.ne.s32.totalorder %s69_s23, %s486_s11  ;;  %p492_p9 = scmp.lt.s32.totalorder %s486_s11, %s486_s11 }
  0x50   :  { %p493_p10 = por %p492_p9, %p491_p8 }
  0x52   :  { %p494_p11 = pnand %p493_p10, %p487_p7 }
  0x54   :  { %497 = shalt.err (!%p494_p11)
}
  0x55   :  { %74 = dma.hbm_to_vmem [thread:$0]  %s718_s4, 256, %s69_s23, [#allocation9], %s554_s9, %s554_s9, %s555_s10  }
  0x56   :  { %542 = dma.done.wait [#allocation3], 256  }
  0x57   :  { %543 = vsyncadd [#allocation3], 4294967040 }
  0x58   :  { %544 = dma.done.wait [#allocation6], 528  }
  0x59   :  { %545 = vsyncadd [#allocation6], 4294966768 }
  0x5a   :  { %546 = dma.done.wait [#allocation9], 512  }
  0x5b   :  { %547 = vsyncadd [#allocation9], 4294966784  ;;  %v559_v0 = vmov 0   ;;  %vm105_vm0 = vcmask 261120   ;;  %v92_v1 = vld [vmem:[#allocation5] sm:$0xff]  ;;  %v93_v2 = vld [vmem:[#allocation5 + $0x8] sm:$0xff]  ;;  %v231_v32 = vlaneseq }
  0x5c   :  { %374 = vset.pattern.permute.xlu0 %v559_v0  ;;  %375 = vset.pattern.permute.xlu1 %v559_v0  ;;  %v94_v3 = vld [vmem:[#allocation5 + $0x10] sm:$0xff]  ;;  %v351_v4 = vpack.c.bf16 %v93_v2, %v92_v1  ;;  %v95_v5 = vld [vmem:[#allocation5 + $0x18] sm:$0xff]  ;;  %v97_v8 = vld [vmem:[#allocation8] sm:$0xff]  ;;  %v560_v48 = vmov 0.0   ;;  %vm259_vm7 = vcmask 7168   ;;  %s561_s4 = smov [#allocation11]  }
  0x5d   :  { %v90_v6 = vld [vmem:[#allocation2] sm:$0xff]  ;;  %v355_v7 = vpack.c.bf16 %v95_v5, %v94_v3  ;;  %v187_v10 = vsub.f32 1.0, %v97_v8  ;;  %v91_v14 = vld [vmem:[#allocation2 + $0x8] sm:$0xff]  ;;  %v329_v17 = vld [vmem:[#allocation7] ss:$0 sm:$0xff]  ;;  %v680_v34 = vand.u32 127, %v231_v32 }
  0x5e   :  { %348 = vmatprep.mubr.msk.f32.mxu0 %vm105_vm0, %v90_v6  ;;  %v98_v9 = vld [vmem:[#allocation8 + $0x8] sm:$0xff]  ;;  %352 = vmatprep.subr.bf16.mxu0 %v351_v4  ;;  %v229_v15 = vld [vmem:[#allocation10] sm:$0xff]  ;;  %v230_v25 = vld [vmem:[#allocation10 + $0x8] sm:$0xff]  ;;  %s301_s3 = sshll.u32 %s561_s4, 4  ;;  %s302_s3 = int_to_ptr.vmem [resolvable:$true] %s301_s3 }
  0x5f   :  { %v188_v11 = vsub.f32 1.0, %v98_v9  ;;  %354 = vmatpush3.bf16.msra.mxu0 %v351_v4  ;;  %v189_v12 = vmul.f32 -1e+32, %v187_v10  ;;  %vm248_vm3 = vcmp.ne.s32.totalorder %v230_v25, 0  ;;  %vm247_vm4 = vcmp.ne.s32.totalorder %v229_v15, 0  ;;  %s498_s24 = scalar_lea.vmem %s302_s3, 256  ;;  %p503_p13 = scmp.lt.s32.totalorder %s302_s3, %s302_s3 }
  0x60   :  { %356 = vmatprep.subr.bf16.mxu0 %v355_v7  ;;  %v333_v49 = vsel %vm248_vm3, 1.0, %v560_v48  ;;  %v332_v54 = vsel %vm247_vm4, 1.0, %v560_v48  ;;  %p499_p12 = scmp.ne.s32.totalorder %s302_s3, %s498_s24  ;;  %p504_p0 = scmp.lt.s32.totalorder %s498_s24, %s498_s24 }
  0x61   :  { %193 = vperm.xlu0 %374, %v189_v12   ;;  %v190_v13 = vmul.f32 -1e+32, %v188_v11  ;;  %vm254_vm5 = vcmp.gt.f32.partialorder %v333_v49, 0.0  ;;  %vm253_vm6 = vcmp.gt.f32.partialorder %v332_v54, 0.0  ;;  %v272_v63 = vsel %vm259_vm7, %v332_v54, 0.0 }
  0x62   :  { %v273_v0 = vsel %vm259_vm7, %v333_v49, 0.0  ;;  %p505_p1 = por %p504_p0, %p503_p13 }
  0x63   :  { %358 = vmatpush3.bf16.msra.mxu0 %v355_v7  ;;  %v274_v2 = vadd.f32 %v273_v0, %v272_v63 }
  0x64   :  { %p506_p2 = pnand %p505_p1, %p499_p12 }
  0x65   :  { %198 = vperm.xlu0 %374, %v190_v13  }
  0x66   :  { %349 = vmatmul.mubr.msk.f32.vlgmr.msra.gmra.mrb[0].mxu0 %vm105_vm0, %v91_v14 }
  0x69   :  { %234 = vperm.xlu0 %374, %v229_v15  }
  0xe0   :  { %v194_v16 = vpop.permute.xlu0 %193 }
  0xe4   :  { %v199_v21 = vpop.permute.xlu0 %198 }
  0xe8   :  { %v235_v36 = vpop.permute.xlu0 %234 }
  0xe9   :  { %vm239_vm1 = vcmp.eq.s32.totalorder %v680_v34, %v235_v36 }
 0x139   :  { %v350_v18 = vpop.f32.mrb[0].mxu0 }
 0x13a   :  { %v184_v19 = vadd.f32 %v350_v18, %v329_v17  ;;  %v178_v20 = vpop.f32.mrb[1].mxu0 }
 0x13b   :  { %v179_v23 = vadd.f32 %v329_v17, %v178_v20 }
 0x13c   :  { %v202_v22 = vadd.f32 %v199_v21, %v184_v19 }
 0x13d   :  { %v201_v24 = vadd.f32 %v194_v16, %v179_v23 }
 0x13e   :  { %205 = vmax.xlane.f32.xlu1 %v202_v22 }
 0x13f   :  { %v241_v38 = vsel %vm239_vm1, %v201_v24, 0.0 }
 0x142   :  { %203 = vmax.xlane.f32.xlu1 %v201_v24 }
 0x153   :  { %237 = vperm.xlu1 %375, %v230_v25  }
 0x1cb   :  { %v206_v26 = vpop.xlane.xlu1 %205 }
 0x1cc   :  { %v208_v27 = vsub.f32 %v202_v22, %v206_v26 }
 0x1ce   :  { %v211_v28 = vmul.f32 1.442695, %v208_v27 }
 0x1cf   :  { %v204_v29 = vpop.xlane.xlu1 %203 }
 0x1d0   :  { %376 = vpow2.f32 %v211_v28  ;;  %v207_v30 = vsub.f32 %v201_v24, %v204_v29 }
 0x1d2   :  { %v209_v31 = vmul.f32 1.442695, %v207_v30 }
 0x1d3   :  { %v238_v37 = vpop.permute.xlu1 %237 }
 0x1d4   :  { %378 = vpow2.f32 %v209_v31  ;;  %vm240_vm2 = vcmp.eq.s32.totalorder %v680_v34, %v238_v37 }
 0x1d5   :  { %v242_v39 = vsel %vm240_vm2, %v202_v22, 0.0 }
 0x1da   :  { %v377_v33 = vpop.eup %376 }
 0x1db   :  { %215 = vadd.xlane.f32.xlu1 %v377_v33 }
 0x1de   :  { %v379_v35 = vpop.eup %378 }
 0x1df   :  { %213 = vadd.xlane.f32.xlu0 %v379_v35 }
 0x1e3   :  { %243 = vadd.xlane.f32.xlu0 %v241_v38 }
 0x1e7   :  { %245 = vadd.xlane.f32.xlu0 %v242_v39 }
 0x268   :  { %v216_v40 = vpop.xlane.xlu1 %215 }
 0x269   :  { %380 = vrcp.f32 %v216_v40 }
 0x26a   :  { %382 = vlog2.f32 %v216_v40 }
 0x26c   :  { %v214_v41 = vpop.xlane.xlu0 %213 }
 0x26d   :  { %384 = vrcp.f32 %v214_v41 }
 0x26e   :  { %386 = vlog2.f32 %v214_v41 }
 0x270   :  { %v244_v42 = vpop.xlane.xlu0 %243 }
 0x273   :  { %v381_v43 = vpop.eup %380 }
 0x274   :  { %v383_v44 = vpop.eup %382  ;;  %v220_v45 = vmul.f32 %v381_v43, %v377_v33  ;;  %v246_v52 = vpop.xlane.xlu0 %245 }
 0x275   :  { %v224_v46 = vmul.f32 0.6931472, %v383_v44 }
 0x276   :  { %228 = vst [vmem:[#allocation11 + $0x8] sm:$0xff] %v220_v45 }
 0x277   :  { %v385_v47 = vpop.eup %384  ;;  %v226_v50 = vadd.f32 %v224_v46, %v206_v26 }
 0x278   :  { %v387_v51 = vpop.eup %386  ;;  %v219_v53 = vmul.f32 %v385_v47, %v379_v35 }
 0x279   :  { %v222_v55 = vmul.f32 0.6931472, %v387_v51  ;;  %v256_v56 = vsub.f32 %v226_v50, %v246_v52 }
 0x27a   :  { %227 = vst [vmem:[#allocation11] sm:$0xff] %v219_v53 }
 0x27b   :  { %v225_v57 = vadd.f32 %v222_v55, %v204_v29  ;;  %v258_v59 = vsel %vm254_vm5, %v256_v56, 0.0 }
 0x27c   :  { %v261_v62 = vsel %vm259_vm7, %v258_v59, 0.0 }
 0x27d   :  { %v255_v58 = vsub.f32 %v225_v57, %v244_v42 }
 0x27f   :  { %v257_v60 = vsel %vm253_vm6, %v255_v58, 0.0 }
 0x280   :  { %v260_v61 = vsel %vm259_vm7, %v257_v60, 0.0 }
 0x281   :  { %v262_v1 = vadd.f32 %v261_v62, %v260_v61 }
 0x283   :  { %263 = vadd.xlane.f32.xlu0 %v262_v1 }
 0x287   :  { %275 = vadd.xlane.f32.xlu0 %v274_v2 }
 0x288   :  { %509 = shalt.err (!%p506_p2)
}
 0x289   :  { %s510_s14 = scalar_lea.hbm %s719_s5, 256 }
 0x28a   :  { %p511_p3 = scmp.ne.s32.totalorder %s719_s5, %s510_s14  ;;  %p514_p4 = scmp.lt.u32.totalorder %s510_s14, %s719_s5 }
 0x28c   :  { %p516_p5 = pnand %p514_p4, %p511_p3 }
 0x28e   :  { %519 = shalt.err (!%p516_p5)
}
 0x28f   :  { %307 = dma.vmem_to_hbm [thread:$0]  %s302_s3, 256, %s719_s5, [#allocation4], %s554_s9, %s554_s9, %s555_s10   ;;  %v285_v17 = vshrl.u32 %v231_v32, 7  ;;  %vm289_vm9 = vcmp.eq.s32.totalorder %v680_v34, 1  ;;  %vm287_vm10 = vcmp.eq.s32.totalorder %v680_v34, 0 }
 0x290   :  { %s562_s9 = smov [#allocation12]  }
 0x291   :  { %vm286_vm8 = vcmp.eq.s32.totalorder %v285_v17, 0  ;;  %s314_s10 = sshll.u32 %s562_s9, 4  ;;  %s315_s10 = int_to_ptr.vmem [resolvable:$true] %s314_s10 }
 0x292   :  { %vm290_vm11 = vmand %vm286_vm8, %vm289_vm9  ;;  %s520_s0 = scalar_lea.vmem %s315_s10, 128  ;;  %p525_p7 = scmp.lt.s32.totalorder %s315_s10, %s315_s10 }
 0x293   :  { %vm288_vm12 = vmand %vm286_vm8, %vm287_vm10  ;;  %p521_p6 = scmp.ne.s32.totalorder %s315_s10, %s520_s0  ;;  %p526_p8 = scmp.lt.s32.totalorder %s520_s0, %s520_s0 }
 0x295   :  { %p527_p9 = por %p526_p8, %p525_p7 }
 0x297   :  { %p528_p10 = pnand %p527_p9, %p521_p6 }
 0x310   :  { %v264_v3 = vpop.xlane.xlu0 %263 }
 0x311   :  { %v265_v4 = vrot.slane %v264_v3, 4 }
 0x313   :  { %v266_v5 = vadd.f32 %v265_v4, %v264_v3 }
 0x314   :  { %v276_v6 = vpop.xlane.xlu0 %275 }
 0x315   :  { %v267_v7 = vrot.slane %v266_v5, 2  ;;  %v277_v8 = vrot.slane %v276_v6, 4 }
 0x317   :  { %v278_v9 = vadd.f32 %v277_v8, %v276_v6  ;;  %v268_v10 = vadd.f32 %v267_v7, %v266_v5 }
 0x319   :  { %v279_v11 = vrot.slane %v278_v9, 2  ;;  %v269_v12 = vrot.slane %v268_v10, 1 }
 0x31b   :  { %v280_v13 = vadd.f32 %v279_v11, %v278_v9  ;;  %v270_v14 = vadd.f32 %v269_v12, %v268_v10 }
 0x31d   :  { %359 = vpush %v270_v14  ;;  %v281_v15 = vrot.slane %v280_v13, 1 }
 0x31f   :  { %v282_v16 = vadd.f32 %v281_v15, %v280_v13 }
 0x321   :  { %361 = vpush %v282_v16 }
 0x34e   :  { %s360_s5 = spop %359 }
 0x34f   :  { %v293_v19 = vstv %s360_s5 }
 0x352   :  { %s362_s1 = spop %361 }
 0x353   :  { %v291_v18 = vstv %s362_s1 }
 0x354   :  { %v292_v20 = vsel %vm290_vm11, %v291_v18, 0.0 }
 0x355   :  { %v294_v21 = vsel %vm288_vm12, %v293_v19, %v292_v20 }
 0x356   :  { %295 = vst [vmem:[#allocation12] sm:$0xff] %v294_v21 }
 0x357   :  { %531 = shalt.err (!%p528_p10)
}
 0x358   :  { %s532_s23 = scalar_lea.hbm %s720_s6, 128 }
 0x359   :  { %p533_p11 = scmp.ne.s32.totalorder %s720_s6, %s532_s23  ;;  %p536_p12 = scmp.lt.u32.totalorder %s532_s23, %s720_s6 }
 0x35b   :  { %p538_p13 = pnand %p536_p12, %p533_p11 }
 0x35d   :  { %541 = shalt.err (!%p538_p13)
}
 0x35e   :  { %317 = dma.vmem_to_hbm [thread:$0]  %s315_s10, 128, %s720_s6, [#allocation13]  }
 0x35f   :  { %548 = dma.done.wait [#allocation4], 256  }
 0x360   :  { %549 = vsyncadd [#allocation4], 4294967040 }
 0x361   :  { %550 = dma.done.wait [#allocation13], 128  }
 0x362   :  { %551 = vsyncadd [#allocation13], 4294967168 }
 0x363   :  { %324 = vsyncpa [#allocation3], 1 }
 0x364   :  { %325 = vsyncpa [#allocation6], 1 }
 0x365   :  { %326 = vsyncpa [#allocation9], 1 }
 0x366   :  { %327 = vsyncpa [#allocation4], 1 }
 0x367   :  { %328 = vsyncpa [#allocation13], 1 }

</bundles_post_ra>
